<compile_context>
chip_gen: v5e
topology: v5e:2x2
jax: 0.10.0
libtpu: 0.0.40
codegen_flags: <defaults>
</compile_context>

<pallas_src>
import functools

import jax
import jax.numpy as jnp
from jax.experimental import pallas as pl
from jax.experimental.pallas import tpu as pltpu

IGNORE_INDEX = 255
_LANES = 128
_BLOCK_BYTES = 1024 * 1024        # ~f32 bytes per input block (lane-padded), per buffer
_VMEM_LIMIT = 32 * 1024 * 1024    # explicit scoped-VMEM budget; safe on v5e/v6e/v7x


def _boundary_bce_kernel(edge_ref, boundary_ref, target_ref, out_ref, *,
                         block_rows, total_rows, ignore_index):
    edge = edge_ref[...].astype(jnp.float32)          # (block_rows, cols)
    boundary = boundary_ref[...].astype(jnp.float32)  # (block_rows, cols)
    target = target_ref[...].astype(jnp.int32)        # (block_rows, cols)

    valid = target != ignore_index
    # Rows of a partial last block lying past the end of the array hold
    # unspecified data -- mask them out (static check; only emitted if needed).
    if total_rows % block_rows != 0:
        row = (pl.program_id(0) * block_rows
               + jax.lax.broadcasted_iota(jnp.int32, edge.shape, 0))
        valid = valid & (row < total_rows)

    pos = (boundary == 1.0) & valid
    neg = (boundary == 0.0) & valid

    # Per-pixel BCE with the log term clamped at -100 (F.binary_cross_entropy
    # semantics).  Only log(edge) matters on pos pixels and log(1-edge) on neg
    # pixels; every other pixel (ignored, fractional boundary, ragged-tail
    # padding) gets arg = 1.0 and contributes exactly 0 -- so the total-BCE
    # reduction needs no extra mask and neg_bce = total_bce - pos_bce.
    arg = jnp.where(pos, edge, jnp.where(neg, 1.0 - edge, 1.0))
    nll = -jnp.maximum(jnp.log(arg), -100.0)

    pos_f = pos.astype(jnp.float32)

    mask_sum = jnp.sum(valid.astype(jnp.float32))
    pos_sum = jnp.sum(pos_f)
    neg_sum = jnp.sum(neg.astype(jnp.float32))
    pos_bce = jnp.sum(pos_f * nll)
    tot_bce = jnp.sum(nll)
    # TODO(synk): on v7x (VALU-bound regime) the lane reductions could be
    # offloaded to the idle MXU via dot(x, ones((cols,1)), precision=HIGHEST).

    # Pack the 5 partial sums into lanes 0..4 of this block's output row.
    lane = jax.lax.broadcasted_iota(jnp.int32, (1, _LANES), 1)
    out_ref[...] = (jnp.where(lane == 0, mask_sum, 0.0)
                    + jnp.where(lane == 1, pos_sum, 0.0)
                    + jnp.where(lane == 2, neg_sum, 0.0)
                    + jnp.where(lane == 3, pos_bce, 0.0)
                    + jnp.where(lane == 4, tot_bce, 0.0))


def boundary_bce_loss(edge, target, boundary, ignore_index=IGNORE_INDEX,
                      block_rows=None):
    n = edge.shape[0]
    h, w = edge.shape[-2], edge.shape[-1]
    total = n * h * w

    # Pick a lane-dense 2-D view of the contiguous slab; fall back to (N*H, W)
    # (full-W lane block) when no multiple-of-128 factorisation exists.
    rows, cols = None, None
    for c in (512, 256, 128):
        if total % c == 0:
            rows, cols = total // c, c
            break
    if rows is None:
        rows, cols = n * h, w

    # Layout-preserving reshapes; native dtypes go straight into the kernel.
    edge2 = edge.reshape(rows, cols)
    boundary2 = boundary.reshape(rows, cols)
    target2 = target.reshape(rows, cols)

    # Sublane multiple: 8 for 32-bit inputs, 32 if any input is sub-32-bit
    # (sublane packing).
    itemsizes = (edge2.dtype.itemsize, boundary2.dtype.itemsize,
                 target2.dtype.itemsize)
    row_mult = 8 if min(itemsizes) >= 4 else 32

    if block_rows is None:
        # Size the row-block so each (lane-padded) f32 input block is about
        # _BLOCK_BYTES: 3 inputs x 2 pipeline buffers + block-sized temporaries
        # stay well inside _VMEM_LIMIT on every generation.
        padded_cols = ((cols + _LANES - 1) // _LANES) * _LANES
        block_rows = max(row_mult,
                         (_BLOCK_BYTES // (4 * padded_cols))
                         // row_mult * row_mult)
    # Megacore (v7x): ensure at least 2 blocks whenever the array allows it.
    if rows > row_mult:
        half = -(-rows // 2)                      # ceil(rows / 2)
        half = -(-half // row_mult) * row_mult    # round up to row_mult
        block_rows = min(block_rows, half)
    block_rows = min(block_rows, rows)            # full-dim block if tiny
    num_blocks = -(-rows // block_rows)

    kernel = functools.partial(
        _boundary_bce_kernel,
        block_rows=block_rows, total_rows=rows, ignore_index=ignore_index)

    partials = pl.pallas_call(
        kernel,
        out_shape=jax.ShapeDtypeStruct((num_blocks, _LANES), jnp.float32),
        grid=(num_blocks,),
        in_specs=[
            pl.BlockSpec((block_rows, cols), lambda i: (i, 0)),
            pl.BlockSpec((block_rows, cols), lambda i: (i, 0)),
            pl.BlockSpec((block_rows, cols), lambda i: (i, 0)),
        ],
        out_specs=pl.BlockSpec((1, _LANES), lambda i: (i, 0)),
        compiler_params=pltpu.CompilerParams(
            dimension_semantics=("parallel",),
            vmem_limit_bytes=_VMEM_LIMIT),
    )(edge2, boundary2, target2)

    # Tiny final combine in plain JAX.
    sums = jnp.sum(partials, axis=0)
    mask_sum, pos_sum, neg_sum, pos_bce, tot_bce = (
        sums[0], sums[1], sums[2], sums[3], sums[4])
    neg_bce = tot_bce - pos_bce
    num = jnp.maximum(mask_sum, 1.0)
    pos_weight = neg_sum / num   # weight applied where boundary == 1
    neg_weight = pos_sum / num   # weight applied where boundary == 0
    return (pos_weight * pos_bce + neg_weight * neg_bce) / num


def boundary_bce_loss_ref(edge, target, boundary, ignore_index=IGNORE_INDEX):
    # Pure-JAX reference mirroring the PyTorch module.
    edge = jnp.squeeze(edge, axis=1)
    mask = target != ignore_index
    pos = (boundary == 1.0) & mask
    neg = (boundary == 0.0) & mask
    num = jnp.maximum(mask.sum().astype(jnp.float32), 1.0)
    pos_w = neg.sum().astype(jnp.float32) / num
    neg_w = pos.sum().astype(jnp.float32) / num
    weight = jnp.where(pos, pos_w, jnp.where(neg, neg_w, 0.0))
    log_e = jnp.maximum(jnp.log(edge), -100.0)
    log_1me = jnp.maximum(jnp.log(1.0 - edge), -100.0)
    bce = -(boundary * log_e + (1.0 - boundary) * log_1me)
    return jnp.sum(weight * bce) / num


if __name__ == "__main__":
    key = jax.random.PRNGKey(0)

    def make_inputs(k, n, h, w):
        k1, k2, k3, k4 = jax.random.split(k, 4)
        edge = jax.nn.sigmoid(jax.random.normal(k1, (n, 1, h, w), jnp.float32))
        boundary = (jax.random.uniform(k2, (n, h, w)) < 0.3).astype(jnp.float32)
        target = jax.random.randint(k3, (n, h, w), 0, 5).astype(jnp.int32)
        ignore = jax.random.uniform(k4, (n, h, w)) < 0.2
        target = jnp.where(ignore, IGNORE_INDEX, target).astype(jnp.int32)
        return edge, target, boundary

    k1, k2, k3 = jax.random.split(key, 3)

    # Case 1: lane-dense path, single full-dim block (total = 512 -> (1, 512)).
    edge, target, boundary = make_inputs(k1, 2, 16, 16)
    loss = jax.block_until_ready(boundary_bce_loss(edge, target, boundary))
    ref = boundary_bce_loss_ref(edge, target, boundary)
    assert jnp.allclose(loss, ref, rtol=1e-5, atol=1e-5), (loss, ref)

    # Case 2: fallback (N*H, W) path, multi-block grid with ragged row tail.
    edge, target, boundary = make_inputs(k2, 2, 18, 24)  # rows=36 -> blocks of 8
    loss = jax.block_until_ready(
        boundary_bce_loss(edge, target, boundary, block_rows=8))
    ref = boundary_bce_loss_ref(edge, target, boundary)
    assert jnp.allclose(loss, ref, rtol=1e-5, atol=1e-5), (loss, ref)

    # Case 3: lane-dense re-chunked path, multi-block grid with ragged tail
    # (total = 5120 -> (10, 512) -> 2 blocks of 8 rows, 2-row tail).
    edge, target, boundary = make_inputs(k3, 2, 40, 64)
    loss = jax.block_until_ready(boundary_bce_loss(edge, target, boundary))
    ref = boundary_bce_loss_ref(edge, target, boundary)
    assert jnp.allclose(loss, ref, rtol=1e-5, atol=1e-5), (loss, ref)

    print("KERNEL_OK")
</pallas_src>

<mosaic_0001>
module attributes {stable_mosaic.version = 11 : i64} {
  func.func @_boundary_bce_kernel(%arg0: i32, %arg1: memref<1x512xf32, #tpu.memory_space<vmem>>, %arg2: memref<1x512xf32, #tpu.memory_space<vmem>>, %arg3: memref<1x512xi32, #tpu.memory_space<vmem>>, %arg4: memref<1x128xf32, #tpu.memory_space<vmem>>) attributes {dimension_semantics = [#tpu.dimension_semantics<parallel>], iteration_bounds = array<i64: 1>, scalar_prefetch = 0 : i64, scratch_operands = 0 : i64, tpu.core_type = #tpu.core_type<tc>, window_params = [{transform_indices = @transform_0, window_bounds = array<i64: 1, 512>}, {transform_indices = @transform_1, window_bounds = array<i64: 1, 512>}, {transform_indices = @transform_2, window_bounds = array<i64: 1, 512>}, {transform_indices = @transform_3, window_bounds = array<i64: 1, 128>}]} {
    %c0 = arith.constant 0 : index
    %c0_0 = arith.constant 0 : index
    %0 = vector.load %arg1[%c0, %c0_0] : memref<1x512xf32, #tpu.memory_space<vmem>>, vector<1x512xf32>
    %c0_1 = arith.constant 0 : index
    %c0_2 = arith.constant 0 : index
    %1 = vector.load %arg2[%c0_1, %c0_2] : memref<1x512xf32, #tpu.memory_space<vmem>>, vector<1x512xf32>
    %c0_3 = arith.constant 0 : index
    %c0_4 = arith.constant 0 : index
    %2 = vector.load %arg3[%c0_3, %c0_4] : memref<1x512xi32, #tpu.memory_space<vmem>>, vector<1x512xi32>
    %c255_i32 = arith.constant 255 : i32
    %3 = vector.broadcast %c255_i32 : i32 to vector<1x512xi32>
    %4 = arith.cmpi ne, %2, %3 : vector<1x512xi32>
    %cst = arith.constant 1.000000e+00 : f32
    %5 = vector.broadcast %cst : f32 to vector<1x512xf32>
    %6 = arith.cmpf oeq, %1, %5 : vector<1x512xf32>
    %7 = arith.andi %6, %4 : vector<1x512xi1>
    %cst_5 = arith.constant 0.000000e+00 : f32
    %8 = vector.broadcast %cst_5 : f32 to vector<1x512xf32>
    %9 = arith.cmpf oeq, %1, %8 : vector<1x512xf32>
    %10 = arith.andi %9, %4 : vector<1x512xi1>
    %cst_6 = arith.constant 1.000000e+00 : f32
    %11 = vector.broadcast %cst_6 : f32 to vector<1x512xf32>
    %12 = arith.subf %11, %0 : vector<1x512xf32>
    %cst_7 = arith.constant 1.000000e+00 : f32
    %13 = vector.broadcast %cst_7 : f32 to vector<1x512xf32>
    %14 = arith.select %10, %12, %13 : vector<1x512xi1>, vector<1x512xf32>
    %15 = arith.select %7, %0, %14 : vector<1x512xi1>, vector<1x512xf32>
    %16 = math.log %15 : vector<1x512xf32>
    %cst_8 = arith.constant -1.000000e+02 : f32
    %17 = vector.broadcast %cst_8 : f32 to vector<1x512xf32>
    %18 = arith.maximumf %16, %17 : vector<1x512xf32>
    %cst_9 = arith.constant 0.000000e+00 : f32
    %19 = vector.broadcast %cst_9 : f32 to vector<1x512xf32>
    %20 = arith.subf %19, %18 : vector<1x512xf32>
    %21 = arith.extui %7 : vector<1x512xi1> to vector<1x512xi32>
    %22 = arith.sitofp %21 : vector<1x512xi32> to vector<1x512xf32>
    %23 = arith.extui %4 : vector<1x512xi1> to vector<1x512xi32>
    %24 = arith.sitofp %23 : vector<1x512xi32> to vector<1x512xf32>
    %25 = vector.shape_cast %24 : vector<1x512xf32> to vector<1x1x512xf32>
    %cst_10 = arith.constant dense<0.000000e+00> : vector<1xf32>
    %26 = vector.multi_reduction <add>, %25, %cst_10 [1, 2] : vector<1x1x512xf32> to vector<1xf32>
    %27 = vector.shape_cast %26 : vector<1xf32> to vector<1x1x1xf32>
    %28 = vector.extract %27[0, 0, 0] : f32 from vector<1x1x1xf32>
    %29 = vector.shape_cast %22 : vector<1x512xf32> to vector<1x1x512xf32>
    %cst_11 = arith.constant dense<0.000000e+00> : vector<1xf32>
    %30 = vector.multi_reduction <add>, %29, %cst_11 [1, 2] : vector<1x1x512xf32> to vector<1xf32>
    %31 = vector.shape_cast %30 : vector<1xf32> to vector<1x1x1xf32>
    %32 = vector.extract %31[0, 0, 0] : f32 from vector<1x1x1xf32>
    %33 = arith.extui %10 : vector<1x512xi1> to vector<1x512xi32>
    %34 = arith.sitofp %33 : vector<1x512xi32> to vector<1x512xf32>
    %35 = vector.shape_cast %34 : vector<1x512xf32> to vector<1x1x512xf32>
    %cst_12 = arith.constant dense<0.000000e+00> : vector<1xf32>
    %36 = vector.multi_reduction <add>, %35, %cst_12 [1, 2] : vector<1x1x512xf32> to vector<1xf32>
    %37 = vector.shape_cast %36 : vector<1xf32> to vector<1x1x1xf32>
    %38 = vector.extract %37[0, 0, 0] : f32 from vector<1x1x1xf32>
    %39 = arith.mulf %22, %20 : vector<1x512xf32>
    %40 = vector.shape_cast %39 : vector<1x512xf32> to vector<1x1x512xf32>
    %cst_13 = arith.constant dense<0.000000e+00> : vector<1xf32>
    %41 = vector.multi_reduction <add>, %40, %cst_13 [1, 2] : vector<1x1x512xf32> to vector<1xf32>
    %42 = vector.shape_cast %41 : vector<1xf32> to vector<1x1x1xf32>
    %43 = vector.extract %42[0, 0, 0] : f32 from vector<1x1x1xf32>
    %44 = vector.shape_cast %20 : vector<1x512xf32> to vector<1x1x512xf32>
    %cst_14 = arith.constant dense<0.000000e+00> : vector<1xf32>
    %45 = vector.multi_reduction <add>, %44, %cst_14 [1, 2] : vector<1x1x512xf32> to vector<1xf32>
    %46 = vector.shape_cast %45 : vector<1xf32> to vector<1x1x1xf32>
    %47 = vector.extract %46[0, 0, 0] : f32 from vector<1x1x1xf32>
    %48 = tpu.iota {dimensions = array<i32: 1>} : vector<1x128xi32>
    %c0_i32 = arith.constant 0 : i32
    %49 = vector.broadcast %c0_i32 : i32 to vector<1x128xi32>
    %50 = arith.cmpi eq, %48, %49 : vector<1x128xi32>
    %cst_15 = arith.constant 0.000000e+00 : f32
    %51 = vector.broadcast %28 : f32 to vector<1x128xf32>
    %52 = vector.broadcast %cst_15 : f32 to vector<1x128xf32>
    %53 = arith.select %50, %51, %52 : vector<1x128xi1>, vector<1x128xf32>
    %c1_i32 = arith.constant 1 : i32
    %54 = vector.broadcast %c1_i32 : i32 to vector<1x128xi32>
    %55 = arith.cmpi eq, %48, %54 : vector<1x128xi32>
    %cst_16 = arith.constant 0.000000e+00 : f32
    %56 = vector.broadcast %32 : f32 to vector<1x128xf32>
    %57 = vector.broadcast %cst_16 : f32 to vector<1x128xf32>
    %58 = arith.select %55, %56, %57 : vector<1x128xi1>, vector<1x128xf32>
    %59 = arith.addf %53, %58 : vector<1x128xf32>
    %c2_i32 = arith.constant 2 : i32
    %60 = vector.broadcast %c2_i32 : i32 to vector<1x128xi32>
    %61 = arith.cmpi eq, %48, %60 : vector<1x128xi32>
    %cst_17 = arith.constant 0.000000e+00 : f32
    %62 = vector.broadcast %38 : f32 to vector<1x128xf32>
    %63 = vector.broadcast %cst_17 : f32 to vector<1x128xf32>
    %64 = arith.select %61, %62, %63 : vector<1x128xi1>, vector<1x128xf32>
    %65 = arith.addf %59, %64 : vector<1x128xf32>
    %c3_i32 = arith.constant 3 : i32
    %66 = vector.broadcast %c3_i32 : i32 to vector<1x128xi32>
    %67 = arith.cmpi eq, %48, %66 : vector<1x128xi32>
    %cst_18 = arith.constant 0.000000e+00 : f32
    %68 = vector.broadcast %43 : f32 to vector<1x128xf32>
    %69 = vector.broadcast %cst_18 : f32 to vector<1x128xf32>
    %70 = arith.select %67, %68, %69 : vector<1x128xi1>, vector<1x128xf32>
    %71 = arith.addf %65, %70 : vector<1x128xf32>
    %c4_i32 = arith.constant 4 : i32
    %72 = vector.broadcast %c4_i32 : i32 to vector<1x128xi32>
    %73 = arith.cmpi eq, %48, %72 : vector<1x128xi32>
    %cst_19 = arith.constant 0.000000e+00 : f32
    %74 = vector.broadcast %47 : f32 to vector<1x128xf32>
    %75 = vector.broadcast %cst_19 : f32 to vector<1x128xf32>
    %76 = arith.select %73, %74, %75 : vector<1x128xi1>, vector<1x128xf32>
    %77 = arith.addf %71, %76 : vector<1x128xf32>
    %c0_20 = arith.constant 0 : index
    %c0_21 = arith.constant 0 : index
    %78 = vector.load %arg4[%c0_20, %c0_21] : memref<1x128xf32, #tpu.memory_space<vmem>>, vector<1x128xf32>
    tpu.vector_store %arg4[%c0_20, %c0_21], %77 {strides = array<i32>} : memref<1x128xf32, #tpu.memory_space<vmem>>, vector<1x128xf32>,
    return
  }
  func.func @transform_0(%arg0: i32) -> (i32, i32) {
    %c0_i32 = arith.constant 0 : i32
    %c0_i32_0 = arith.constant 0 : i32
    return %arg0, %c0_i32 : i32, i32
  }
  func.func @transform_1(%arg0: i32) -> (i32, i32) {
    %c0_i32 = arith.constant 0 : i32
    %c0_i32_0 = arith.constant 0 : i32
    return %arg0, %c0_i32 : i32, i32
  }
  func.func @transform_2(%arg0: i32) -> (i32, i32) {
    %c0_i32 = arith.constant 0 : i32
    %c0_i32_0 = arith.constant 0 : i32
    return %arg0, %c0_i32 : i32, i32
  }
  func.func @transform_3(%arg0: i32) -> (i32, i32) {
    %c0_i32 = arith.constant 0 : i32
    %c0_i32_0 = arith.constant 0 : i32
    return %arg0, %c0_i32 : i32, i32
  }
}

</mosaic_0001>

<bundles_post_ra>
// kernel: tpu_custom_call.1
= control target key start
LH: loop header
LB: loop body
LE: loop exit
PB: predicated region body
PF: predicated region fallthrough
CT: control target
= control target key end

     0   :  { %8 = vsyncpa [#allocation3], 0  ;;  %s431_s0 = inlined_call_operand.hbm [shape: f32[1,512], index: 0, kind: input, shape index: {}]   ;;  %s432_s1 = inlined_call_operand.hbm [shape: f32[1,512], index: 1, kind: input, shape index: {}]   ;;  %s433_s2 = inlined_call_operand.hbm [shape: s32[1,512], index: 2, kind: input, shape index: {}]   ;;  %s434_s3 = inlined_call_operand.hbm [shape: f32[1,128], index: 3, kind: output, shape index: {}]  }
   0x1   :  { %9 = vsyncpa [#allocation6], 0  ;;  %s27_s14 = sshll.u32 %s432_s1, 4  ;;  %s28_s14 = int_to_ptr.hbm [resolvable:$true] %s27_s14 }
   0x2   :  { %10 = vsyncpa [#allocation4], 0  ;;  %s366_s15 = smov [#allocation5]   ;;  %s16_s19 = sshll.u32 %s431_s0, 4  ;;  %s17_s19 = int_to_ptr.hbm [resolvable:$true] %s16_s19 }
   0x3   :  { %s29_s16 = sshll.u32 %s366_s15, 4  ;;  %s367_s20 = smov [#allocation2]   ;;  %s30_s16 = int_to_ptr.vmem [resolvable:$true] %s29_s16 }
   0x4   :  { %32 = dma.hbm_to_vmem [thread:$0]  %s28_s14, 64, %s30_s16, [#allocation6]  }
   0x5   :  { %s18_s21 = sshll.u32 %s367_s20, 4  ;;  %s38_s24 = sshll.u32 %s433_s2, 4  ;;  %s19_s21 = int_to_ptr.vmem [resolvable:$true] %s18_s21  ;;  %s39_s24 = int_to_ptr.hbm [resolvable:$true] %s38_s24 }
   0x6   :  { %21 = dma.hbm_to_vmem [thread:$0]  %s17_s19, 64, %s19_s21, [#allocation3]  }
   0x7   :  { %s368_s1 = smov [#allocation7]  }
   0x8   :  { %s40_s25 = sshll.u32 %s368_s1, 4  ;;  %s41_s25 = int_to_ptr.vmem [resolvable:$true] %s40_s25 }
   0x9   :  { %43 = dma.hbm_to_vmem [thread:$0]  %s39_s24, 64, %s41_s25, [#allocation6]  }
   0xa   :  { %360 = dma.done.wait [#allocation3], 64  }
   0xb   :  { %361 = vsyncadd [#allocation3], 4294967232 }
   0xc   :  { %362 = dma.done.wait [#allocation6], 128  }
   0xd   :  { %363 = vsyncadd [#allocation6], 4294967168  ;;  %v58_v0 = vld [vmem:[#allocation7] sm:$0xf]  ;;  %v57_v1 = vld [vmem:[#allocation5] sm:$0xf] }
   0xe   :  { %v56_v2 = vld [vmem:[#allocation2] sm:$0xf]  ;;  %vm59_vm0 = vcmp.ne.s32.totalorder %v58_v0, 255  ;;  %vm62_vm1 = vcmp.eq.f32.partialorder %v57_v1, 0.0  ;;  %vm60_vm2 = vcmp.eq.f32.partialorder %v57_v1, 1.0  ;;  %v369_v4 = vmov 0.0  }
   0xf   :  { %v64_v3 = vsub.f32 1.0, %v56_v2  ;;  %v245_v5 = vsel %vm59_vm0, 1.0, %v369_v4  ;;  %vm84_vm3 = vcmask 1040384   ;;  %vm63_vm4 = vmand %vm62_vm1, %vm59_vm0  ;;  %s370_s29 = smov [#allocation8]   ;;  %s233_s6 = sshll.u32 %s434_s3, 4  ;;  %s234_s6 = int_to_ptr.hbm [resolvable:$true] %s233_s6 }
  0x10   :  { %v76_v6 = vperm.slane %v245_v5, 0  ;;  %v77_v7 = vperm.slane %v245_v5, 1  ;;  %v78_v8 = vperm.slane %v245_v5, 2  ;;  %v79_v9 = vperm.slane %v245_v5, 3  ;;  %vm400_vm5 = vmand %vm60_vm2, %vm59_vm0  ;;  %s231_s30 = sshll.u32 %s370_s29, 4  ;;  %s232_s30 = int_to_ptr.vmem [resolvable:$true] %s231_s30 }
  0x11   :  { %v246_v11 = vsel %vm63_vm4, 1.0, %v369_v4  ;;  %v65_v12 = vsel %vm63_vm4, %v64_v3, 1.0  ;;  %v244_v13 = vsel %vm400_vm5, 1.0, %v369_v4 }
  0x12   :  { %v85_v14 = vsel %vm84_vm3, %v76_v6, 0.0  ;;  %v86_v15 = vsel %vm84_vm3, %v77_v7, 0.0  ;;  %v88_v16 = vsel %vm84_vm3, %v78_v8, 0.0  ;;  %v90_v17 = vsel %vm84_vm3, %v79_v9, 0.0 }
  0x13   :  { %v87_v18 = vadd.f32 %v86_v15, %v85_v14  ;;  %v129_v19 = vperm.slane %v246_v11, 0  ;;  %v130_v20 = vperm.slane %v246_v11, 1  ;;  %v131_v21 = vperm.slane %v246_v11, 2 }
  0x14   :  { %v132_v22 = vperm.slane %v246_v11, 3  ;;  %v66_v23 = vsel %vm400_vm5, %v56_v2, %v65_v12  ;;  %v102_v24 = vperm.slane %v244_v13, 0  ;;  %v103_v25 = vperm.slane %v244_v13, 1 }
  0x15   :  { %v89_v26 = vadd.f32 %v88_v16, %v87_v18  ;;  %v137_v27 = vsel %vm84_vm3, %v129_v19, 0.0  ;;  %v138_v28 = vsel %vm84_vm3, %v130_v20, 0.0  ;;  %v140_v29 = vsel %vm84_vm3, %v131_v21, 0.0 }
  0x16   :  { %v139_v30 = vadd.f32 %v138_v28, %v137_v27  ;;  %v142_v31 = vsel %vm84_vm3, %v132_v22, 0.0  ;;  %262 = vlog2.f32 %v66_v23  ;;  %v104_v32 = vperm.slane %v244_v13, 2 }
  0x17   :  { %v91_v33 = vadd.f32 %v90_v17, %v89_v26  ;;  %v105_v34 = vperm.slane %v244_v13, 3  ;;  %v110_v35 = vsel %vm84_vm3, %v102_v24, 0.0  ;;  %v111_v36 = vsel %vm84_vm3, %v103_v25, 0.0 }
  0x18   :  { %v141_v37 = vadd.f32 %v140_v29, %v139_v30  ;;  %v112_v38 = vadd.f32 %v111_v36, %v110_v35  ;;  %v113_v39 = vsel %vm84_vm3, %v104_v32, 0.0 }
  0x19   :  { %92 = vadd.xlane.f32.xlu0 %v91_v33  ;;  %v115_v42 = vsel %vm84_vm3, %v105_v34, 0.0 }
  0x1a   :  { %v143_v40 = vadd.f32 %v142_v31, %v141_v37  ;;  %v114_v41 = vadd.f32 %v113_v39, %v112_v38 }
  0x1c   :  { %v263_v43 = vpop.eup %262  ;;  %144 = vadd.xlane.f32.xlu1 %v143_v40  ;;  %v116_v45 = vadd.f32 %v115_v42, %v114_v41  ;;  %v204_v42 = vlaneseq }
  0x1d   :  { %v68_v44 = vmul.f32 0.6931472, %v263_v43 }
  0x1e   :  { %v205_v43 = vand.u32 127, %v204_v42 }
  0x1f   :  { %v69_v46 = vmax.f32 %v68_v44, -100.0 }
  0x20   :  { %vm209_vm6 = vcmp.eq.s32.totalorder %v205_v43, 1  ;;  %vm206_vm7 = vcmp.eq.s32.totalorder %v205_v43, 0  ;;  %vm213_vm8 = vcmp.eq.s32.totalorder %v205_v43, 2  ;;  %vm217_vm9 = vcmp.eq.s32.totalorder %v205_v43, 3 }
  0x21   :  { %v70_v47 = vsub.f32 0.0, %v69_v46  ;;  %117 = vadd.xlane.f32.xlu0 %v116_v45  ;;  %vm221_vm10 = vcmp.eq.s32.totalorder %v205_v43, 4 }
  0x23   :  { %v180_v48 = vperm.slane %v70_v47, 0  ;;  %v181_v49 = vperm.slane %v70_v47, 1  ;;  %v182_v50 = vperm.slane %v70_v47, 2  ;;  %v183_v51 = vperm.slane %v70_v47, 3 }
  0x24   :  { %v153_v52 = vmul.f32 %v244_v13, %v70_v47 }
  0x25   :  { %v188_v53 = vsel %vm84_vm3, %v180_v48, 0.0  ;;  %v189_v54 = vsel %vm84_vm3, %v181_v49, 0.0  ;;  %v191_v55 = vsel %vm84_vm3, %v182_v50, 0.0  ;;  %v193_v60 = vsel %vm84_vm3, %v183_v51, 0.0 }
  0x26   :  { %v190_v56 = vadd.f32 %v189_v54, %v188_v53  ;;  %v155_v57 = vperm.slane %v153_v52, 0  ;;  %v156_v58 = vperm.slane %v153_v52, 1  ;;  %v157_v59 = vperm.slane %v153_v52, 2 }
  0x27   :  { %v158_v61 = vperm.slane %v153_v52, 3 }
  0x28   :  { %v192_v62 = vadd.f32 %v191_v55, %v190_v56  ;;  %v163_v63 = vsel %vm84_vm3, %v155_v57, 0.0  ;;  %v164_v0 = vsel %vm84_vm3, %v156_v58, 0.0  ;;  %v166_v1 = vsel %vm84_vm3, %v157_v59, 0.0 }
  0x29   :  { %v165_v2 = vadd.f32 %v164_v0, %v163_v63  ;;  %v168_v4 = vsel %vm84_vm3, %v158_v61, 0.0 }
  0x2a   :  { %v194_v3 = vadd.f32 %v193_v60, %v192_v62 }
  0x2b   :  { %v167_v5 = vadd.f32 %v166_v1, %v165_v2 }
  0x2c   :  { %195 = vadd.xlane.f32.xlu2 %v194_v3 }
  0x2d   :  { %v169_v6 = vadd.f32 %v168_v4, %v167_v5 }
  0x2f   :  { %170 = vadd.xlane.f32.xlu1 %v169_v6 }
  0x8c   :  { %v93_v7 = vpop.xlane.xlu0 %92 }
  0x8d   :  { %v94_v8 = vrot.slane %v93_v7, 4 }
  0x8f   :  { %v95_v9 = vadd.f32 %v94_v8, %v93_v7  ;;  %v145_v10 = vpop.xlane.xlu1 %144 }
  0x90   :  { %v146_v11 = vrot.slane %v145_v10, 4 }
  0x91   :  { %v96_v12 = vrot.slane %v95_v9, 2 }
  0x92   :  { %v147_v13 = vadd.f32 %v146_v11, %v145_v10 }
  0x93   :  { %v97_v14 = vadd.f32 %v96_v12, %v95_v9 }
  0x94   :  { %v148_v15 = vrot.slane %v147_v13, 2  ;;  %v118_v16 = vpop.xlane.xlu0 %117 }
  0x95   :  { %v119_v17 = vrot.slane %v118_v16, 4  ;;  %v98_v18 = vrot.slane %v97_v14, 1 }
  0x96   :  { %v149_v21 = vadd.f32 %v148_v15, %v147_v13 }
  0x97   :  { %v120_v19 = vadd.f32 %v119_v17, %v118_v16  ;;  %v99_v20 = vadd.f32 %v98_v18, %v97_v14 }
  0x98   :  { %v150_v24 = vrot.slane %v149_v21, 1 }
  0x99   :  { %v121_v22 = vrot.slane %v120_v19, 2  ;;  %247 = vpush %v99_v20 }
  0x9a   :  { %v151_v29 = vadd.f32 %v150_v24, %v149_v21 }
  0x9b   :  { %v122_v23 = vadd.f32 %v121_v22, %v120_v19 }
  0x9d   :  { %v123_v25 = vrot.slane %v122_v23, 1 }
  0x9f   :  { %v196_v26 = vpop.xlane.xlu2 %195  ;;  %v124_v27 = vadd.f32 %v123_v25, %v122_v23 }
  0xa0   :  { %v197_v28 = vrot.slane %v196_v26, 4 }
  0xa1   :  { %249 = vpush %v124_v27 }
  0xa2   :  { %v198_v30 = vadd.f32 %v197_v28, %v196_v26  ;;  %v171_v31 = vpop.xlane.xlu1 %170  ;;  %251 = vpush %v151_v29 }
  0xa3   :  { %v172_v32 = vrot.slane %v171_v31, 4 }
  0xa4   :  { %v199_v33 = vrot.slane %v198_v30, 2 }
  0xa5   :  { %v173_v34 = vadd.f32 %v172_v32, %v171_v31 }
  0xa6   :  { %v200_v35 = vadd.f32 %v199_v33, %v198_v30 }
  0xa7   :  { %v174_v36 = vrot.slane %v173_v34, 2 }
  0xa8   :  { %v201_v38 = vrot.slane %v200_v35, 1 }
  0xa9   :  { %v175_v37 = vadd.f32 %v174_v36, %v173_v34 }
  0xaa   :  { %v202_v41 = vadd.f32 %v201_v38, %v200_v35 }
  0xab   :  { %v176_v39 = vrot.slane %v175_v37, 1 }
  0xad   :  { %v177_v40 = vadd.f32 %v176_v39, %v175_v37 }
  0xaf   :  { %253 = vpush %v177_v40 }
  0xb0   :  { %255 = vpush %v202_v41 }
  0xca   :  { %s248_s0 = spop %247 }
  0xcb   :  { %v207_v45 = vstv %s248_s0 }
  0xcc   :  { %v208_v47 = vsel %vm206_vm7, %v207_v45, 0.0 }
  0xd2   :  { %s250_s2 = spop %249 }
  0xd3   :  { %v210_v44 = vstv %s250_s2  ;;  %s252_s26 = spop %251 }
  0xd4   :  { %v211_v46 = vsel %vm209_vm6, %v210_v44, 0.0  ;;  %v214_v49 = vstv %s252_s26 }
  0xd5   :  { %v212_v48 = vadd.f32 %v211_v46, %v208_v47  ;;  %v215_v50 = vsel %vm213_vm8, %v214_v49, 0.0 }
  0xd7   :  { %v216_v51 = vadd.f32 %v215_v50, %v212_v48 }
  0xe0   :  { %s254_s27 = spop %253 }
  0xe1   :  { %v218_v52 = vstv %s254_s27  ;;  %s256_s28 = spop %255 }
  0xe2   :  { %v219_v53 = vsel %vm217_vm9, %v218_v52, 0.0  ;;  %v222_v54 = vstv %s256_s28 }
  0xe3   :  { %v220_v55 = vadd.f32 %v219_v53, %v216_v51  ;;  %v223_v56 = vsel %vm221_vm10, %v222_v54, 0.0 }
  0xe5   :  { %v224_v57 = vadd.f32 %v223_v56, %v220_v55 }
  0xe7   :  { %225 = vst [vmem:[#allocation8] sm:$0x1] %v224_v57 }
  0xe8   :  { %236 = dma.vmem_to_hbm [thread:$0]  %s232_s30, 16, %s234_s6, [#allocation4]  }
  0xe9   :  { %364 = dma.done.wait [#allocation4], 16  }
  0xea   :  { %365 = vsyncadd [#allocation4], 4294967280 }
  0xeb   :  { %241 = vsyncpa [#allocation3], 1 }
  0xec   :  { %242 = vsyncpa [#allocation6], 1 }
  0xed   :  { %243 = vsyncpa [#allocation4], 1 }

</bundles_post_ra>
